<compile_context>
chip_gen: v6e
topology: v6e:2x2x1
jax: 0.10.0
libtpu: 0.0.40
codegen_flags: <defaults>
</compile_context>

<pallas_src>
import functools

import jax
import jax.numpy as jnp
from jax.experimental import pallas as pl
from jax.experimental.pallas import tpu as pltpu


def _round_up(x, n):
    return (x + n - 1) // n * n


def _lora_kernel(x_ref, a_ref, b_ref, o_ref, *, scale):
    # (tm, in_f) @ (in_f, rank_p) -> f32 accumulate on the MXU.
    h = jnp.dot(x_ref[...], a_ref[...], preferred_element_type=jnp.float32)
    # Scale the tiny (tm, rank_p) intermediate in f32, then cast so the second
    # matmul runs on the fast bf16 MXU path with half the vreg footprint.
    h = (h * scale).astype(b_ref.dtype)
    out = jnp.dot(h, b_ref[...], preferred_element_type=jnp.float32)
    o_ref[...] = out.astype(o_ref.dtype)


def linear_adapter_forward(x, a_w, b_w, *, alpha=32,
                           compute_dtype=jnp.bfloat16, tm_max=512):
    """x: [..., in_features]; a_w: [in_features, dim]; b_w: [dim, out_features]."""
    # TODO(synk): dropout with p>0 (training mode) not implemented; p=0.0 default is identity.
    in_features, dim = a_w.shape
    out_features = b_w.shape[1]
    scale = alpha / dim
    out_dtype = x.dtype

    lead_shape = x.shape[:-1]
    m = 1
    for s in lead_shape:
        m *= s
    x2d = x.reshape(m, in_features)

    # Lane-dense padding of the rank and output-feature axes (multiples of 128).
    rank_p = _round_up(dim, 128)
    of_p = _round_up(out_features, 128)

    itemsize = jnp.dtype(compute_dtype).itemsize
    out_itemsize = jnp.dtype(out_dtype).itemsize

    # Token-tile sizing: double-buffered x tile + out tile must fit a
    # conservative VMEM budget (leaves room for weights + h on every chip gen).
    budget = 24 << 20
    per_row = 2 * (in_features * itemsize + of_p * out_itemsize)
    tm = min(tm_max, max(8, budget // per_row))
    tm = max(8, (tm // 8) * 8)            # sublane-aligned
    tm = min(tm, _round_up(m, 8))         # don't exceed (padded) token count
    m_pad = _round_up(m, tm)

    # Pad + cast inputs (zeros in padded regions leave the math unchanged).
    x_p = x2d.astype(compute_dtype)
    if m_pad != m:
        x_p = jnp.pad(x_p, ((0, m_pad - m), (0, 0)))
    a_p = a_w.astype(compute_dtype)
    if rank_p != dim:
        a_p = jnp.pad(a_p, ((0, 0), (0, rank_p - dim)))
    b_p = b_w.astype(compute_dtype)
    if rank_p != dim or of_p != out_features:
        b_p = jnp.pad(b_p, ((0, rank_p - dim), (0, of_p - out_features)))

    # Explicit VMEM limit with headroom (covers v5e's 16 MiB scoped default).
    vmem_need = (2 * tm * in_features * itemsize          # x double buffer
                 + 2 * tm * of_p * out_itemsize           # out double buffer
                 + (in_features * rank_p + rank_p * of_p) * itemsize  # weights
                 + tm * rank_p * 4)                       # f32 intermediate h
    vmem_limit = min(max(int(vmem_need * 3 // 2) + (2 << 20), 16 << 20), 64 << 20)

    cost = pl.CostEstimate(
        flops=2 * m * dim * (in_features + out_features),
        transcendentals=0,
        bytes_accessed=(m * in_features * itemsize
                        + m * out_features * out_itemsize
                        + (in_features * dim + dim * out_features) * itemsize),
    )

    kernel = functools.partial(_lora_kernel, scale=scale)

    out_padded = pl.pallas_call(
        kernel,
        out_shape=jax.ShapeDtypeStruct((m_pad, of_p), out_dtype),
        grid=(m_pad // tm,),
        in_specs=[
            pl.BlockSpec((tm, in_features), lambda i: (i, 0)),     # streamed
            pl.BlockSpec((in_features, rank_p), lambda i: (0, 0)), # resident
            pl.BlockSpec((rank_p, of_p), lambda i: (0, 0)),        # resident
        ],
        out_specs=pl.BlockSpec((tm, of_p), lambda i: (i, 0)),
        compiler_params=pltpu.CompilerParams(
            dimension_semantics=("parallel",),
            vmem_limit_bytes=vmem_limit,
        ),
        cost_estimate=cost,
    )(x_p, a_p, b_p)

    out2d = out_padded[:m, :out_features]
    return out2d.reshape(*lead_shape, out_features)


def init_params(key, in_features, dim, out_features, dtype=jnp.float32):
    """Deterministic init matching the PyTorch module's __init__."""
    # nn.init.kaiming_uniform_(lora_a.weight, a=sqrt(5)):
    #   bound = sqrt(6 / ((1 + a^2) * fan_in)) = 1 / sqrt(fan_in)
    bound = 1.0 / (in_features ** 0.5)
    # PyTorch weight is [dim, in_features]; we store the transpose [in_features, dim].
    a_w = jax.random.uniform(
        key, (in_features, dim), minval=-bound, maxval=bound, dtype=dtype
    )
    # nn.init.zeros_(lora_b.weight) -> [dim, out_features] all zeros.
    b_w = jnp.zeros((dim, out_features), dtype=dtype)
    return a_w, b_w


if __name__ == "__main__":
    key = jax.random.PRNGKey(0)
    k_x, k_a, k_b = jax.random.split(key, 3)

    batch, seq, in_features = 2, 8, 32
    dim, out_features, alpha = 8, 32, 32
    scale = alpha / dim

    x = jax.random.normal(k_x, (batch, seq, in_features), dtype=jnp.float32)
    a_w, b_w = init_params(k_a, in_features, dim, out_features)

    # Module-faithful init (b_w == 0) -> output must be exactly zero.
    out_zero = linear_adapter_forward(x, a_w, b_w, alpha=alpha)

    # Random b_w so the full matmul path is actually numerically exercised.
    b_rand = 0.1 * jax.random.normal(k_b, (dim, out_features), dtype=jnp.float32)
    out = linear_adapter_forward(x, a_w, b_rand, alpha=alpha)
    out = jax.block_until_ready(out)

    x2d = x.reshape(-1, in_features)

    # Reference mimicking the kernel's dtype strategy (bf16 operands, f32 acc).
    h = jnp.dot(x2d.astype(jnp.bfloat16), a_w.astype(jnp.bfloat16),
                preferred_element_type=jnp.float32)
    h = (h * scale).astype(jnp.bfloat16)
    ref = jnp.dot(h, b_rand.astype(jnp.bfloat16),
                  preferred_element_type=jnp.float32)
    ref = ref.astype(x.dtype).reshape(batch, seq, out_features)

    # Coarse pure-f32 semantics check.
    ref_f32 = ((x2d @ a_w @ b_rand) * scale).reshape(batch, seq, out_features)

    assert out.shape == (batch, seq, out_features)
    assert out.dtype == x.dtype
    assert jnp.allclose(out_zero, 0.0)
    assert jnp.allclose(out, ref, atol=1e-3, rtol=1e-3)
    assert jnp.allclose(out, ref_f32, atol=5e-2, rtol=5e-2)

    print("KERNEL_OK")
</pallas_src>

<mosaic_0001>
module attributes {stable_mosaic.version = 11 : i64} {
  func.func @_lora_kernel(%arg0: i32, %arg1: memref<16x32xbf16, #tpu.memory_space<vmem>>, %arg2: memref<32x128xbf16, #tpu.memory_space<vmem>>, %arg3: memref<128x128xbf16, #tpu.memory_space<vmem>>, %arg4: memref<16x128xf32, #tpu.memory_space<vmem>>) attributes {dimension_semantics = [#tpu.dimension_semantics<parallel>], iteration_bounds = array<i64: 1>, scalar_prefetch = 0 : i64, scratch_operands = 0 : i64, tpu.core_type = #tpu.core_type<tc>, window_params = [{transform_indices = @transform_0, window_bounds = array<i64: 16, 32>}, {pipeline_mode = #tpu.pipeline_mode<synchronous>, transform_indices = @transform_1, window_bounds = array<i64: 32, 128>}, {pipeline_mode = #tpu.pipeline_mode<synchronous>, transform_indices = @transform_2, window_bounds = array<i64: 128, 128>}, {transform_indices = @transform_3, window_bounds = array<i64: 16, 128>}]} {
    %c0 = arith.constant 0 : index
    %c0_0 = arith.constant 0 : index
    %0 = vector.load %arg1[%c0, %c0_0] : memref<16x32xbf16, #tpu.memory_space<vmem>>, vector<16x32xbf16>
    %c0_1 = arith.constant 0 : index
    %c0_2 = arith.constant 0 : index
    %1 = vector.load %arg2[%c0_1, %c0_2] : memref<32x128xbf16, #tpu.memory_space<vmem>>, vector<32x128xbf16>
    %cst = arith.constant dense<0.000000e+00> : vector<16x128xf32>
    %2 = tpu.matmul %0, %1, %cst {dimension_numbers = #tpu.dot_dimension_numbers<[1], [0], [0], [1], [0, 0, 1, 1], [], []>} : vector<16x32xbf16>, vector<32x128xbf16>, vector<16x128xf32> -> vector<16x128xf32>
    %cst_3 = arith.constant 4.000000e+00 : f32
    %3 = vector.broadcast %cst_3 : f32 to vector<16x128xf32>
    %4 = arith.mulf %2, %3 : vector<16x128xf32>
    %5 = arith.truncf %4 : vector<16x128xf32> to vector<16x128xbf16>
    %c0_4 = arith.constant 0 : index
    %c0_5 = arith.constant 0 : index
    %6 = vector.load %arg3[%c0_4, %c0_5] : memref<128x128xbf16, #tpu.memory_space<vmem>>, vector<128x128xbf16>
    %cst_6 = arith.constant dense<0.000000e+00> : vector<16x128xf32>
    %7 = tpu.matmul %5, %6, %cst_6 {dimension_numbers = #tpu.dot_dimension_numbers<[1], [0], [0], [1], [0, 0, 1, 1], [], []>} : vector<16x128xbf16>, vector<128x128xbf16>, vector<16x128xf32> -> vector<16x128xf32>
    %c0_7 = arith.constant 0 : index
    %c0_8 = arith.constant 0 : index
    %8 = vector.load %arg4[%c0_7, %c0_8] : memref<16x128xf32, #tpu.memory_space<vmem>>, vector<16x128xf32>
    tpu.vector_store %arg4[%c0_7, %c0_8], %7 {strides = array<i32>} : memref<16x128xf32, #tpu.memory_space<vmem>>, vector<16x128xf32>,
    return
  }
  func.func @transform_0(%arg0: i32) -> (i32, i32) {
    %c0_i32 = arith.constant 0 : i32
    %c0_i32_0 = arith.constant 0 : i32
    return %arg0, %c0_i32 : i32, i32
  }
  func.func @transform_1(%arg0: i32) -> (i32, i32) {
    %c0_i32 = arith.constant 0 : i32
    %c0_i32_0 = arith.constant 0 : i32
    %c0_i32_1 = arith.constant 0 : i32
    return %c0_i32, %c0_i32_0 : i32, i32
  }
  func.func @transform_2(%arg0: i32) -> (i32, i32) {
    %c0_i32 = arith.constant 0 : i32
    %c0_i32_0 = arith.constant 0 : i32
    %c0_i32_1 = arith.constant 0 : i32
    return %c0_i32, %c0_i32_0 : i32, i32
  }
  func.func @transform_3(%arg0: i32) -> (i32, i32) {
    %c0_i32 = arith.constant 0 : i32
    %c0_i32_0 = arith.constant 0 : i32
    return %arg0, %c0_i32 : i32, i32
  }
}

</mosaic_0001>

<bundles_post_ra>
// kernel: tpu_custom_call.1
= control target key start
LH: loop header
LB: loop body
LE: loop exit
PB: predicated region body
PF: predicated region fallthrough
CT: control target
= control target key end

     0   :  { %8 = vsyncpa [#allocation3], 0  ;;  %s454_s0 = inlined_call_operand.hbm [shape: bf16[16,32], index: 0, kind: input, shape index: {}]   ;;  %s455_s1 = inlined_call_operand.hbm [shape: bf16[32,128], index: 1, kind: input, shape index: {}]   ;;  %s456_s2 = inlined_call_operand.hbm [shape: bf16[128,128], index: 2, kind: input, shape index: {}]   ;;  %s457_s3 = inlined_call_operand.hbm [shape: f32[16,128], index: 3, kind: output, shape index: {}]  }
   0x1   :  { %9 = vsyncpa [#allocation6], 0 }
   0x2   :  { %10 = vsyncpa [#allocation4], 0  ;;  %s412_s12 = smov [#allocation5]   ;;  %s413_s14 = smov [#allocation2]  }
   0x3   :  { %s28_s13 = sshll.u32 %s412_s12, 4  ;;  %s16_s15 = sshll.u32 %s413_s14, 4  ;;  %s29_s13 = int_to_ptr.vmem [resolvable:$true] %s28_s13  ;;  %s17_s15 = int_to_ptr.vmem [resolvable:$true] %s16_s15 }
   0x4   :  { %s334_s16 = scalar_lea.vmem %s29_s13, 256  ;;  %p339_p1 = scmp.lt.s32.totalorder %s29_s13, %s29_s13 }
   0x5   :  { %p335_p0 = scmp.ne.s32.totalorder %s29_s13, %s334_s16  ;;  %p340_p2 = scmp.lt.s32.totalorder %s334_s16, %s334_s16 }
   0x7   :  { %p341_p3 = por %p340_p2, %p339_p1 }
   0x9   :  { %p342_p4 = pnand %p341_p3, %p335_p0 }
   0xb   :  { %345 = shalt.err (!%p342_p4)
}
   0xc   :  { %s414_s17 = smov 64   ;;  %s415_s18 = smov 4  }
   0xd   :  { %34 = dma.hbm_to_vmem [thread:$0]  %s455_s1, 256, %s29_s13, [#allocation6], %s414_s17, %s414_s17, %s415_s18  }
   0xe   :  { %s354_s21 = scalar_lea.vmem %s17_s15, 128  ;;  %p359_p6 = scmp.lt.s32.totalorder %s17_s15, %s17_s15 }
   0xf   :  { %p355_p5 = scmp.ne.s32.totalorder %s17_s15, %s354_s21  ;;  %p360_p7 = scmp.lt.s32.totalorder %s354_s21, %s354_s21 }
  0x11   :  { %p361_p8 = por %p360_p7, %p359_p6 }
  0x13   :  { %p362_p9 = pnand %p361_p8, %p355_p5 }
  0x15   :  { %365 = shalt.err (!%p362_p9)
}
  0x16   :  { %22 = dma.hbm_to_vmem [thread:$0]  %s454_s0, 128, %s17_s15, [#allocation3], %s414_s17, %s414_s17, %s415_s18  }
  0x17   :  { %s416_s24 = smov [#allocation7]  }
  0x18   :  { %s40_s25 = sshll.u32 %s416_s24, 4  ;;  %s41_s25 = int_to_ptr.vmem [resolvable:$true] %s40_s25 }
  0x19   :  { %s374_s26 = scalar_lea.vmem %s41_s25, 1024  ;;  %p379_p11 = scmp.lt.s32.totalorder %s41_s25, %s41_s25 }
  0x1a   :  { %p375_p10 = scmp.ne.s32.totalorder %s41_s25, %s374_s26  ;;  %p380_p12 = scmp.lt.s32.totalorder %s374_s26, %s374_s26 }
  0x1c   :  { %p381_p13 = por %p380_p12, %p379_p11 }
  0x1e   :  { %p382_p0 = pnand %p381_p13, %p375_p10 }
  0x20   :  { %385 = shalt.err (!%p382_p0)
}
  0x21   :  { %46 = dma.hbm_to_vmem [thread:$0]  %s456_s2, 1024, %s41_s25, [#allocation6], %s414_s17, %s414_s17, %s415_s18  }
  0x22   :  { %406 = dma.done.wait [#allocation3], 128  }
  0x23   :  { %407 = vsyncadd [#allocation3], 4294967168 }
  0x24   :  { %408 = dma.done.wait [#allocation6], 1280  }
  0x25   :  { %409 = vsyncadd [#allocation6], 4294966016  ;;  %v417_v0 = vmov 0.0   ;;  %vm418_vm0 = vmmov 0   ;;  %v315_v1 = vld [vmem:[#allocation5 + $0x8] sm:$0xff]   ;;  %v316_v2 = vld [vmem:[#allocation5] sm:$0xff]  }
  0x26   :  { %277 = vmatprep.subr.bf16.mxu0 %v417_v0  ;;  %281 = vmatprep.mubr.msk.bf16.mxu0 %vm418_vm0, %v417_v0  ;;  %v318_v3 = vld [vmem:[#allocation7 + $0x38] sm:$0xff]   ;;  %v317_v4 = vld [vmem:[#allocation2] sm:$0xff]   ;;  %v319_v5 = vld [vmem:[#allocation7 + $0x30] sm:$0xff]   ;;  %vm80_vm1 = vcmask 261120   ;;  %s419_s0 = smov [#allocation8]  }
  0x27   :  { %285 = vmatprep.subr.bf16.mxu1 %v417_v0  ;;  %301 = vmatprep.mubr.msk.bf16.mxu1 %vm418_vm0, %v417_v0  ;;  %v320_v6 = vld [vmem:[#allocation7 + $0x28] sm:$0xff]   ;;  %v321_v7 = vld [vmem:[#allocation7 + $0x20] sm:$0xff]   ;;  %v322_v8 = vld [vmem:[#allocation7 + $0x18] sm:$0xff]   ;;  %s240_s2 = sshll.u32 %s419_s0, 4  ;;  %s241_s2 = int_to_ptr.vmem [resolvable:$true] %s240_s2 }
  0x28   :  { %278 = vmatpush3.bf16.msra.mxu0 %v315_v1  ;;  %286 = vmatpush3.bf16.msra.mxu1 %v318_v3  ;;  %v323_v9 = vld [vmem:[#allocation7 + $0x10] sm:$0xff]   ;;  %v324_v10 = vld [vmem:[#allocation7 + $0x8] sm:$0xff]   ;;  %v325_v11 = vld [vmem:[#allocation7] sm:$0xff]   ;;  %s386_s28 = scalar_lea.vmem %s241_s2, 256  ;;  %p391_p2 = scmp.lt.s32.totalorder %s241_s2, %s241_s2 }
  0x29   :  { %279 = vmatprep.subr.bf16.mxu0 %v417_v0  ;;  %287 = vmatprep.subr.bf16.mxu1 %v417_v0  ;;  %p387_p1 = scmp.ne.s32.totalorder %s241_s2, %s386_s28  ;;  %p392_p3 = scmp.lt.s32.totalorder %s386_s28, %s386_s28 }
  0x2b   :  { %p393_p4 = por %p392_p3, %p391_p2 }
  0x2c   :  { %280 = vmatpush3.bf16.msra.mxu0 %v316_v2  ;;  %288 = vmatpush3.bf16.msra.mxu1 %v319_v5 }
  0x2d   :  { %289 = vmatprep.subr.bf16.mxu1 %v417_v0  ;;  %p394_p5 = pnand %p393_p4, %p387_p1 }
  0x2f   :  { %282 = vmatmul.mubr.msk.bf16.vlgmr.msra.gmra.mxu0 %vm80_vm1, %v317_v4 }
  0x30   :  { %290 = vmatpush3.bf16.msra.mxu1 %v320_v6 }
  0x31   :  { %291 = vmatprep.subr.bf16.mxu1 %v417_v0 }
  0x34   :  { %292 = vmatpush3.bf16.msra.mxu1 %v321_v7 }
  0x35   :  { %293 = vmatprep.subr.bf16.mxu1 %v417_v0 }
  0x38   :  { %294 = vmatpush3.bf16.msra.mxu1 %v322_v8 }
  0x39   :  { %295 = vmatprep.subr.bf16.mxu1 %v417_v0 }
  0x3c   :  { %296 = vmatpush3.bf16.msra.mxu1 %v323_v9 }
  0x3d   :  { %297 = vmatprep.subr.bf16.mxu1 %v417_v0 }
  0x40   :  { %298 = vmatpush3.bf16.msra.mxu1 %v324_v10 }
  0x41   :  { %299 = vmatprep.subr.bf16.mxu1 %v417_v0 }
  0x44   :  { %300 = vmatpush3.bf16.msra.mxu1 %v325_v11 }
  0xef   :  { %v118_v12 = vpop.f32.mrf.mxu0 }
  0xf0   :  { %v125_v15 = vmul.f32 4.0, %v118_v12 }
  0xf1   :  { %v283_v13 = vpop.f32.mrf.mxu0 }
  0xf3   :  { %v121_v14 = vpop.f32.mrf.mxu0 }
  0xf4   :  { %v126_v16 = vmul.f32 4.0, %v121_v14 }
  0xf5   :  { %v284_v17 = vpop.f32.mrf.mxu0 }
  0xf6   :  { %v127_v18 = vpack.c.bf16 %v126_v16, %v125_v15 }
  0xf8   :  { %302 = vmatmul.mubr.bf16.vlgmr.msra.gmra.mxu1 %v127_v18 }
 0x1b8   :  { %v226_v19 = vpop.f32.mrf.mxu1 }
 0x1b9   :  { %233 = vst [vmem:[#allocation8] sm:$0xff] %v226_v19 }
 0x1ba   :  { %v303_v20 = vpop.f32.mrf.mxu1 }
 0x1bc   :  { %v229_v21 = vpop.f32.mrf.mxu1 }
 0x1bd   :  { %234 = vst [vmem:[#allocation8 + $0x8] sm:$0xff] %v229_v21 }
 0x1be   :  { %v304_v22 = vpop.f32.mrf.mxu1 }
 0x1bf   :  { %397 = shalt.err (!%p394_p5)
}
 0x1c0   :  { %s420_s29 = smov 128   ;;  %s421_s30 = smov 8  }
 0x1c1   :  { %246 = dma.vmem_to_hbm [thread:$0]  %s241_s2, 256, %s457_s3, [#allocation4], %s420_s29, %s420_s29, %s421_s30  }
 0x1c2   :  { %410 = dma.done.wait [#allocation4], 256  }
 0x1c3   :  { %411 = vsyncadd [#allocation4], 4294967040 }
 0x1c4   :  { %250 = vsyncpa [#allocation3], 1 }
 0x1c5   :  { %251 = vsyncpa [#allocation6], 1 }
 0x1c6   :  { %252 = vsyncpa [#allocation4], 1 }

</bundles_post_ra>
